<compile_context>
chip_gen: v7x
topology: tpu7x:2x2x1
jax: 0.10.0
libtpu: 0.0.40
codegen_flags: <defaults>
</compile_context>

<pallas_src>
import functools

import jax
import jax.numpy as jnp
from jax.experimental import pallas as pl
from jax.experimental.pallas import tpu as pltpu

_BN_EPS = 1e-5
_ENC_IDS = (0, 1, 1)                # forward() uses encoder_x, encoder_y, encoder_y
_HIGHEST = jax.lax.Precision.HIGHEST   # reference only


def _round_up(x, m):
    return ((x + m - 1) // m) * m


# ----------------------------------------------------------------------------
# Kernel: one TB-row batch tile per grid step; all weights VMEM-resident.
# ----------------------------------------------------------------------------
def _encoder_poe_kernel(data_ref, bid_ref, eps_ref,
                        wenc_ref, wbid_ref, bn_scale_ref, bn_shift_ref,
                        whead_ref, bhead_ref,
                        lat_ref, lib_ref, *, num_feature, dim_latent):
    F, L = num_feature, dim_latent
    x_raw = data_ref[...]                                    # (TB, 3F) raw counts

    # per-modality library size (total counts, pre-log); broadcast to (B, 3, F)
    # happens in the wrapper -> F-times fewer output bytes.
    for m in range(3):
        lib_ref[:, m:m + 1] = jnp.sum(x_raw[:, m * F:(m + 1) * F],
                                      axis=-1, keepdims=True)

    x = jnp.log(x_raw + 1.0)                                 # (TB, 3F)

    # Three Linear(F+S, H) fused into one block-diagonal matmul (K=3F, N=3H);
    # batch-id columns hit all three H blocks via a single (S, 3H) matmul.
    h = jnp.dot(x, wenc_ref[...], preferred_element_type=jnp.float32)
    h = h + jnp.dot(bid_ref[...], wbid_ref[...],
                    preferred_element_type=jnp.float32)
    # Linear bias + BatchNorm1d (inference / running stats) folded to one FMA,
    # then ReLU.  Dropout is identity in eval mode.
    # TODO(synk): training-mode BatchNorm (batch stats) and Dropout masking are
    # not implemented; this kernel is the eval-mode forward pass.
    h = jnp.maximum(h * bn_scale_ref[...] + bn_shift_ref[...], 0.0)  # (TB, 3H)

    # Fused mean/logvar heads: one block-diagonal (3H, 6L) matmul.
    hd = jnp.dot(h, whead_ref[...], preferred_element_type=jnp.float32)
    hd = hd + bhead_ref[...]                                 # (TB, 6L)

    # Product of experts (unit-variance prior expert, as in the PyTorch module).
    mu_prec = jnp.zeros(eps_ref.shape, jnp.float32)
    prec = jnp.zeros(eps_ref.shape, jnp.float32)
    for m in range(3):                                       # static -> unrolled
        mu_m = hd[:, 2 * L * m:2 * L * m + L]
        inv_var_m = jnp.exp(-hd[:, 2 * L * m + L:2 * L * (m + 1)])
        mu_prec = mu_prec + mu_m * inv_var_m
        prec = prec + inv_var_m
    var_joint = pl.reciprocal(1.0 + prec, approx=True)       # == exp(logvar_joint)
    mu_joint = mu_prec * var_joint
    z_poe = mu_joint + jnp.sqrt(var_joint) * eps_ref[...]    # Normal(...).rsample()

    # static-slice stores (no in-kernel lane concatenate)
    lat_ref[:, 0:L] = mu_joint
    lat_ref[:, L:2 * L] = var_joint
    lat_ref[:, 2 * L:3 * L] = z_poe


# ----------------------------------------------------------------------------
# Wrapper
# ----------------------------------------------------------------------------
def encoder_poe_forward(packed, data, batch_id, eps, *, batch_tile=512):
    """data: (B, 3, F) raw counts, batch_id: (B, S) one-hot, eps: (B, L) N(0,1)."""
    B, M, F = data.shape                       # M == 3 (hard-wired in forward())
    S = batch_id.shape[1]
    L = eps.shape[1]
    H3 = packed["w_enc"].shape[1]              # 3 * num_hidden_units

    TB = _round_up(min(batch_tile, _round_up(B, 8)), 8)   # rows per grid step
    Bp = _round_up(B, TB)

    data2 = data.reshape(B, M * F).astype(jnp.float32)     # metadata-only reshape
    bid = batch_id.astype(jnp.float32)
    eps_f = eps.astype(jnp.float32)
    if Bp != B:                                            # pad batch to tile multiple
        pad = ((0, Bp - B), (0, 0))
        data2 = jnp.pad(data2, pad)
        bid = jnp.pad(bid, pad)
        eps_f = jnp.pad(eps_f, pad)

    kern = functools.partial(_encoder_poe_kernel, num_feature=F, dim_latent=L)
    lat, lib = pl.pallas_call(
        kern,
        out_shape=(jax.ShapeDtypeStruct((Bp, 3 * L), jnp.float32),
                   jax.ShapeDtypeStruct((Bp, M), jnp.float32)),
        grid=(Bp // TB,),
        in_specs=[
            pl.BlockSpec((TB, M * F), lambda i: (i, 0)),
            pl.BlockSpec((TB, S), lambda i: (i, 0)),
            pl.BlockSpec((TB, L), lambda i: (i, 0)),
            # weights: constant index_map -> VMEM-resident, not re-DMA'd per tile
            pl.BlockSpec((M * F, H3), lambda i: (0, 0)),
            pl.BlockSpec((S, H3), lambda i: (0, 0)),
            pl.BlockSpec((1, H3), lambda i: (0, 0)),
            pl.BlockSpec((1, H3), lambda i: (0, 0)),
            pl.BlockSpec((H3, 2 * M * L), lambda i: (0, 0)),
            pl.BlockSpec((1, 2 * M * L), lambda i: (0, 0)),
        ],
        out_specs=(pl.BlockSpec((TB, 3 * L), lambda i: (i, 0)),
                   pl.BlockSpec((TB, M), lambda i: (i, 0))),
        compiler_params=pltpu.CompilerParams(
            dimension_semantics=("parallel",),          # megacore over batch tiles
            vmem_limit_bytes=48 * 1024 * 1024),         # safe on v5e/v6e/v7x
    )(data2, bid, eps_f,
      packed["w_enc"], packed["w_bid"], packed["bn_scale"], packed["bn_shift"],
      packed["w_head"], packed["b_head"])

    mu_joint = lat[:B, :L]
    var_joint = lat[:B, L:2 * L]
    z_poe = lat[:B, 2 * L:]
    library_size_factor = jnp.broadcast_to(lib[:B, :, None], (B, M, F))
    return mu_joint, var_joint, z_poe, library_size_factor


# ----------------------------------------------------------------------------
# Parameters: PyTorch-style raw init + kernel packing (block-diagonal, BN fold)
# ----------------------------------------------------------------------------
def init_encoder_poe_params(key, *, num_feature, num_sample, dim_latent,
                            num_hidden_units):
    F, S, L, H = num_feature, num_sample, dim_latent, num_hidden_units
    Din = F + S
    ks = jax.random.split(key, 20)

    def lin_w(k, fan_in, shape):
        lim = 1.0 / jnp.sqrt(jnp.float32(fan_in))
        return jax.random.uniform(k, shape, jnp.float32, -lim, lim)

    # encoder_x / encoder_y (num_hidden_layers = 1).  encoder_z exists in the
    # PyTorch module but forward() never calls it, so it is not materialized.
    # TODO(synk): num_hidden_layers > 1 not implemented (module default is 1).
    enc_w, enc_b, bn_g, bn_b, bn_m, bn_v = [], [], [], [], [], []
    for e in range(2):
        enc_w.append(lin_w(ks[4 * e + 0], Din, (H, Din)))
        enc_b.append(lin_w(ks[4 * e + 1], Din, (H,)))
        bn_g.append(1.0 + 0.1 * jax.random.normal(ks[4 * e + 2], (H,), jnp.float32))
        bn_b.append(0.1 * jax.random.normal(ks[4 * e + 3], (H,), jnp.float32))
        bn_m.append(0.05 * jnp.arange(H, dtype=jnp.float32) / H)
        bn_v.append(1.0 + 0.5 * (jnp.arange(H, dtype=jnp.float32) % 7) / 7.0)

    mean_w, mean_b, lv_w, lv_b = [], [], [], []
    for m in range(3):
        mean_w.append(lin_w(ks[8 + 4 * m + 0], H, (L, H)))
        mean_b.append(lin_w(ks[8 + 4 * m + 1], H, (L,)))
        lv_w.append(lin_w(ks[8 + 4 * m + 2], H, (L, H)))
        lv_b.append(lin_w(ks[8 + 4 * m + 3], H, (L,)))

    return {
        "enc_w": jnp.stack(enc_w), "enc_b": jnp.stack(enc_b),
        "bn_gamma": jnp.stack(bn_g), "bn_beta": jnp.stack(bn_b),
        "bn_mean": jnp.stack(bn_m), "bn_var": jnp.stack(bn_v),
        "mean_w": jnp.stack(mean_w), "mean_b": jnp.stack(mean_b),
        "logvar_w": jnp.stack(lv_w), "logvar_b": jnp.stack(lv_b),
    }


def pack_encoder_poe_params(raw, *, num_feature, num_sample):
    """Pack torch-style params into block-diagonal / BN-folded kernel params."""
    F, S = num_feature, num_sample
    H = raw["enc_w"].shape[1]
    L = raw["mean_w"].shape[1]

    w_enc = jnp.zeros((3 * F, 3 * H), jnp.float32)     # block-diag data weights
    w_bid = jnp.zeros((S, 3 * H), jnp.float32)         # batch-id rows, all blocks
    scales, shifts = [], []
    for m, e in enumerate(_ENC_IDS):
        w = raw["enc_w"][e]                             # (H, F+S), torch layout
        w_enc = w_enc.at[m * F:(m + 1) * F, m * H:(m + 1) * H].set(w[:, :F].T)
        w_bid = w_bid.at[:, m * H:(m + 1) * H].set(w[:, F:].T)
        sc = raw["bn_gamma"][e] / jnp.sqrt(raw["bn_var"][e] + _BN_EPS)
        scales.append(sc)
        shifts.append((raw["enc_b"][e] - raw["bn_mean"][e]) * sc + raw["bn_beta"][e])

    w_head = jnp.zeros((3 * H, 6 * L), jnp.float32)     # block-diag [mean|logvar]
    b_head = []
    for m in range(3):
        w_head = w_head.at[m * H:(m + 1) * H,
                           2 * L * m:2 * L * m + L].set(raw["mean_w"][m].T)
        w_head = w_head.at[m * H:(m + 1) * H,
                           2 * L * m + L:2 * L * (m + 1)].set(raw["logvar_w"][m].T)
        b_head.append(jnp.concatenate([raw["mean_b"][m], raw["logvar_b"][m]]))

    return {
        "w_enc": w_enc,
        "w_bid": w_bid,
        "bn_scale": jnp.concatenate(scales)[None, :],
        "bn_shift": jnp.concatenate(shifts)[None, :],
        "w_head": w_head,
        "b_head": jnp.concatenate(b_head)[None, :],
    }


# ----------------------------------------------------------------------------
# Pure-JAX reference (eval-mode semantics, full f32 matmuls)
# ----------------------------------------------------------------------------
def encoder_poe_forward_ref(raw, data, batch_id, eps):
    B, M, F = data.shape
    lib = jnp.broadcast_to(jnp.sum(data, axis=-1, keepdims=True), data.shape)
    logd = jnp.log(data + 1.0)
    L = raw["mean_w"].shape[1]
    mu_prec = jnp.zeros((B, L), jnp.float32)
    prec = jnp.zeros((B, L), jnp.float32)
    for m, e in enumerate(_ENC_IDS):
        xin = jnp.concatenate([logd[:, m, :], batch_id], axis=-1)
        h = jnp.dot(xin, raw["enc_w"][e].T, precision=_HIGHEST) + raw["enc_b"][e]
        h = ((h - raw["bn_mean"][e])
             * (raw["bn_gamma"][e] / jnp.sqrt(raw["bn_var"][e] + _BN_EPS))
             + raw["bn_beta"][e])
        h = jnp.maximum(h, 0.0)
        mu = jnp.dot(h, raw["mean_w"][m].T, precision=_HIGHEST) + raw["mean_b"][m]
        lv = jnp.dot(h, raw["logvar_w"][m].T, precision=_HIGHEST) + raw["logvar_b"][m]
        inv_var = jnp.exp(-lv)
        mu_prec = mu_prec + mu * inv_var
        prec = prec + inv_var
    var_joint = 1.0 / (1.0 + prec)
    mu_joint = mu_prec * var_joint
    z_poe = mu_joint + jnp.sqrt(var_joint) * eps
    return mu_joint, var_joint, z_poe, lib


if __name__ == "__main__":
    B = 2
    num_feature = 32
    num_modality = 3          # EncoderPOE.forward is hard-wired to 3 modalities
    num_sample = 3
    dim_latent = 16
    num_hidden_units = 32

    key = jax.random.PRNGKey(0)
    kp, kd, kb, ke = jax.random.split(key, 4)

    raw = init_encoder_poe_params(
        kp, num_feature=num_feature, num_sample=num_sample,
        dim_latent=dim_latent, num_hidden_units=num_hidden_units)
    packed = pack_encoder_poe_params(raw, num_feature=num_feature,
                                     num_sample=num_sample)

    data = jax.random.uniform(kd, (B, num_modality, num_feature), jnp.float32,
                              0.0, 5.0)                     # nonnegative counts
    batch_id = jax.nn.one_hot(
        jax.random.randint(kb, (B,), 0, num_sample), num_sample,
        dtype=jnp.float32)
    eps = jax.random.normal(ke, (B, dim_latent), jnp.float32)  # rsample noise

    out = encoder_poe_forward(packed, data, batch_id, eps)
    out = jax.block_until_ready(out)
    ref = encoder_poe_forward_ref(raw, data, batch_id, eps)

    # Kernel matmuls run at default MXU precision (bf16 operands, f32 accumulate)
    # while the reference uses full-f32 HIGHEST, so tolerance is loosened.
    names = ("mu_joint", "var_joint", "z_poe", "library_size_factor")
    for name, o, r in zip(names, out, ref):
        assert o.shape == r.shape, name
        assert jnp.allclose(o, r, atol=2e-2, rtol=2e-2), name

    print("KERNEL_OK")
</pallas_src>

<mosaic_0001>
module attributes {stable_mosaic.version = 11 : i64} {
  func.func @_encoder_poe_kernel(%arg0: i32, %arg1: memref<8x96xf32, #tpu.memory_space<vmem>>, %arg2: memref<8x3xf32, #tpu.memory_space<vmem>>, %arg3: memref<8x16xf32, #tpu.memory_space<vmem>>, %arg4: memref<96x96xf32, #tpu.memory_space<vmem>>, %arg5: memref<3x96xf32, #tpu.memory_space<vmem>>, %arg6: memref<1x96xf32, #tpu.memory_space<vmem>>, %arg7: memref<1x96xf32, #tpu.memory_space<vmem>>, %arg8: memref<96x96xf32, #tpu.memory_space<vmem>>, %arg9: memref<1x96xf32, #tpu.memory_space<vmem>>, %arg10: memref<8x48xf32, #tpu.memory_space<vmem>>, %arg11: memref<8x3xf32, #tpu.memory_space<vmem>>) attributes {dimension_semantics = [#tpu.dimension_semantics<parallel>], iteration_bounds = array<i64: 1>, scalar_prefetch = 0 : i64, scratch_operands = 0 : i64, tpu.core_type = #tpu.core_type<tc>, window_params = [{transform_indices = @transform_0, window_bounds = array<i64: 8, 96>}, {transform_indices = @transform_1, window_bounds = array<i64: 8, 3>}, {transform_indices = @transform_2, window_bounds = array<i64: 8, 16>}, {pipeline_mode = #tpu.pipeline_mode<synchronous>, transform_indices = @transform_3, window_bounds = array<i64: 96, 96>}, {pipeline_mode = #tpu.pipeline_mode<synchronous>, transform_indices = @transform_4, window_bounds = array<i64: 3, 96>}, {pipeline_mode = #tpu.pipeline_mode<synchronous>, transform_indices = @transform_5, window_bounds = array<i64: 1, 96>}, {pipeline_mode = #tpu.pipeline_mode<synchronous>, transform_indices = @transform_6, window_bounds = array<i64: 1, 96>}, {pipeline_mode = #tpu.pipeline_mode<synchronous>, transform_indices = @transform_7, window_bounds = array<i64: 96, 96>}, {pipeline_mode = #tpu.pipeline_mode<synchronous>, transform_indices = @transform_8, window_bounds = array<i64: 1, 96>}, {transform_indices = @transform_9, window_bounds = array<i64: 8, 48>}, {transform_indices = @transform_10, window_bounds = array<i64: 8, 3>}]} {
    %c0 = arith.constant 0 : index
    %c0_0 = arith.constant 0 : index
    %0 = vector.load %arg1[%c0, %c0_0] : memref<8x96xf32, #tpu.memory_space<vmem>>, vector<8x96xf32>
    %1 = vector.extract_strided_slice %0 {offsets = [0, 0], sizes = [8, 32], strides = [1, 1]} : vector<8x96xf32> to vector<8x32xf32>
    %cst = arith.constant dense<0.000000e+00> : vector<8xf32>
    %2 = vector.multi_reduction <add>, %1, %cst [1] : vector<8x32xf32> to vector<8xf32>
    %3 = vector.shape_cast %2 : vector<8xf32> to vector<8x1xf32>
    %c0_1 = arith.constant 0 : index
    %c0_2 = arith.constant 0 : index
    %4 = vector.load %arg11[%c0_1, %c0_2] : memref<8x3xf32, #tpu.memory_space<vmem>>, vector<8x1xf32>
    tpu.vector_store %arg11[%c0_1, %c0_2], %3 {strides = array<i32>} : memref<8x3xf32, #tpu.memory_space<vmem>>, vector<8x1xf32>,
    %5 = vector.extract_strided_slice %0 {offsets = [0, 32], sizes = [8, 32], strides = [1, 1]} : vector<8x96xf32> to vector<8x32xf32>
    %cst_3 = arith.constant dense<0.000000e+00> : vector<8xf32>
    %6 = vector.multi_reduction <add>, %5, %cst_3 [1] : vector<8x32xf32> to vector<8xf32>
    %7 = vector.shape_cast %6 : vector<8xf32> to vector<8x1xf32>
    %c0_4 = arith.constant 0 : index
    %c1 = arith.constant 1 : index
    %8 = vector.load %arg11[%c0_4, %c1] : memref<8x3xf32, #tpu.memory_space<vmem>>, vector<8x1xf32>
    tpu.vector_store %arg11[%c0_4, %c1], %7 {strides = array<i32>} : memref<8x3xf32, #tpu.memory_space<vmem>>, vector<8x1xf32>,
    %9 = vector.extract_strided_slice %0 {offsets = [0, 64], sizes = [8, 32], strides = [1, 1]} : vector<8x96xf32> to vector<8x32xf32>
    %cst_5 = arith.constant dense<0.000000e+00> : vector<8xf32>
    %10 = vector.multi_reduction <add>, %9, %cst_5 [1] : vector<8x32xf32> to vector<8xf32>
    %11 = vector.shape_cast %10 : vector<8xf32> to vector<8x1xf32>
    %c0_6 = arith.constant 0 : index
    %c2 = arith.constant 2 : index
    %12 = vector.load %arg11[%c0_6, %c2] : memref<8x3xf32, #tpu.memory_space<vmem>>, vector<8x1xf32>
    tpu.vector_store %arg11[%c0_6, %c2], %11 {strides = array<i32>} : memref<8x3xf32, #tpu.memory_space<vmem>>, vector<8x1xf32>,
    %cst_7 = arith.constant 1.000000e+00 : f32
    %13 = vector.broadcast %cst_7 : f32 to vector<8x96xf32>
    %14 = arith.addf %0, %13 : vector<8x96xf32>
    %15 = math.log %14 : vector<8x96xf32>
    %c0_8 = arith.constant 0 : index
    %c0_9 = arith.constant 0 : index
    %16 = vector.load %arg4[%c0_8, %c0_9] : memref<96x96xf32, #tpu.memory_space<vmem>>, vector<96x96xf32>
    %cst_10 = arith.constant dense<0.000000e+00> : vector<8x96xf32>
    %17 = tpu.matmul %15, %16, %cst_10 {dimension_numbers = #tpu.dot_dimension_numbers<[1], [0], [0], [1], [0, 0, 1, 1], [], []>} : vector<8x96xf32>, vector<96x96xf32>, vector<8x96xf32> -> vector<8x96xf32>
    %c0_11 = arith.constant 0 : index
    %c0_12 = arith.constant 0 : index
    %18 = vector.load %arg2[%c0_11, %c0_12] : memref<8x3xf32, #tpu.memory_space<vmem>>, vector<8x3xf32>
    %c0_13 = arith.constant 0 : index
    %c0_14 = arith.constant 0 : index
    %19 = vector.load %arg5[%c0_13, %c0_14] : memref<3x96xf32, #tpu.memory_space<vmem>>, vector<3x96xf32>
    %cst_15 = arith.constant dense<0.000000e+00> : vector<8x96xf32>
    %20 = tpu.matmul %18, %19, %cst_15 {dimension_numbers = #tpu.dot_dimension_numbers<[1], [0], [0], [1], [0, 0, 1, 1], [], []>} : vector<8x3xf32>, vector<3x96xf32>, vector<8x96xf32> -> vector<8x96xf32>
    %21 = arith.addf %17, %20 : vector<8x96xf32>
    %c0_16 = arith.constant 0 : index
    %c0_17 = arith.constant 0 : index
    %22 = vector.load %arg6[%c0_16, %c0_17] : memref<1x96xf32, #tpu.memory_space<vmem>>, vector<1x96xf32>
    %23 = vector.broadcast %22 : vector<1x96xf32> to vector<8x96xf32>
    %24 = arith.mulf %21, %23 : vector<8x96xf32>
    %c0_18 = arith.constant 0 : index
    %c0_19 = arith.constant 0 : index
    %25 = vector.load %arg7[%c0_18, %c0_19] : memref<1x96xf32, #tpu.memory_space<vmem>>, vector<1x96xf32>
    %26 = vector.broadcast %25 : vector<1x96xf32> to vector<8x96xf32>
    %27 = arith.addf %24, %26 : vector<8x96xf32>
    %cst_20 = arith.constant 0.000000e+00 : f32
    %28 = vector.broadcast %cst_20 : f32 to vector<8x96xf32>
    %29 = arith.maximumf %27, %28 : vector<8x96xf32>
    %c0_21 = arith.constant 0 : index
    %c0_22 = arith.constant 0 : index
    %30 = vector.load %arg8[%c0_21, %c0_22] : memref<96x96xf32, #tpu.memory_space<vmem>>, vector<96x96xf32>
    %cst_23 = arith.constant dense<0.000000e+00> : vector<8x96xf32>
    %31 = tpu.matmul %29, %30, %cst_23 {dimension_numbers = #tpu.dot_dimension_numbers<[1], [0], [0], [1], [0, 0, 1, 1], [], []>} : vector<8x96xf32>, vector<96x96xf32>, vector<8x96xf32> -> vector<8x96xf32>
    %c0_24 = arith.constant 0 : index
    %c0_25 = arith.constant 0 : index
    %32 = vector.load %arg9[%c0_24, %c0_25] : memref<1x96xf32, #tpu.memory_space<vmem>>, vector<1x96xf32>
    %33 = vector.broadcast %32 : vector<1x96xf32> to vector<8x96xf32>
    %34 = arith.addf %31, %33 : vector<8x96xf32>
    %cst_26 = arith.constant 0.000000e+00 : f32
    %35 = vector.broadcast %cst_26 : f32 to vector<8x16xf32>
    %cst_27 = arith.constant 0.000000e+00 : f32
    %36 = vector.broadcast %cst_27 : f32 to vector<8x16xf32>
    %37 = vector.extract_strided_slice %34 {offsets = [0, 0], sizes = [8, 16], strides = [1, 1]} : vector<8x96xf32> to vector<8x16xf32>
    %38 = vector.extract_strided_slice %34 {offsets = [0, 16], sizes = [8, 16], strides = [1, 1]} : vector<8x96xf32> to vector<8x16xf32>
    %cst_28 = arith.constant 0.000000e+00 : f32
    %39 = vector.broadcast %cst_28 : f32 to vector<8x16xf32>
    %40 = arith.subf %39, %38 : vector<8x16xf32>
    %41 = math.exp %40 : vector<8x16xf32>
    %42 = arith.mulf %37, %41 : vector<8x16xf32>
    %43 = arith.addf %35, %42 : vector<8x16xf32>
    %44 = arith.addf %36, %41 : vector<8x16xf32>
    %45 = vector.extract_strided_slice %34 {offsets = [0, 32], sizes = [8, 16], strides = [1, 1]} : vector<8x96xf32> to vector<8x16xf32>
    %46 = vector.extract_strided_slice %34 {offsets = [0, 48], sizes = [8, 16], strides = [1, 1]} : vector<8x96xf32> to vector<8x16xf32>
    %cst_29 = arith.constant 0.000000e+00 : f32
    %47 = vector.broadcast %cst_29 : f32 to vector<8x16xf32>
    %48 = arith.subf %47, %46 : vector<8x16xf32>
    %49 = math.exp %48 : vector<8x16xf32>
    %50 = arith.mulf %45, %49 : vector<8x16xf32>
    %51 = arith.addf %43, %50 : vector<8x16xf32>
    %52 = arith.addf %44, %49 : vector<8x16xf32>
    %53 = vector.extract_strided_slice %34 {offsets = [0, 64], sizes = [8, 16], strides = [1, 1]} : vector<8x96xf32> to vector<8x16xf32>
    %54 = vector.extract_strided_slice %34 {offsets = [0, 80], sizes = [8, 16], strides = [1, 1]} : vector<8x96xf32> to vector<8x16xf32>
    %cst_30 = arith.constant 0.000000e+00 : f32
    %55 = vector.broadcast %cst_30 : f32 to vector<8x16xf32>
    %56 = arith.subf %55, %54 : vector<8x16xf32>
    %57 = math.exp %56 : vector<8x16xf32>
    %58 = arith.mulf %53, %57 : vector<8x16xf32>
    %59 = arith.addf %51, %58 : vector<8x16xf32>
    %60 = arith.addf %52, %57 : vector<8x16xf32>
    %cst_31 = arith.constant 1.000000e+00 : f32
    %61 = vector.broadcast %cst_31 : f32 to vector<8x16xf32>
    %62 = arith.addf %61, %60 : vector<8x16xf32>
    %63 = tpu.reciprocal %62 {approx = true} : vector<8x16xf32> -> vector<8x16xf32>
    %64 = arith.mulf %59, %63 : vector<8x16xf32>
    %65 = math.sqrt %63 : vector<8x16xf32>
    %c0_32 = arith.constant 0 : index
    %c0_33 = arith.constant 0 : index
    %66 = vector.load %arg3[%c0_32, %c0_33] : memref<8x16xf32, #tpu.memory_space<vmem>>, vector<8x16xf32>
    %67 = arith.mulf %65, %66 : vector<8x16xf32>
    %68 = arith.addf %64, %67 : vector<8x16xf32>
    %c0_34 = arith.constant 0 : index
    %c0_35 = arith.constant 0 : index
    %69 = vector.load %arg10[%c0_34, %c0_35] : memref<8x48xf32, #tpu.memory_space<vmem>>, vector<8x16xf32>
    tpu.vector_store %arg10[%c0_34, %c0_35], %64 {strides = array<i32>} : memref<8x48xf32, #tpu.memory_space<vmem>>, vector<8x16xf32>,
    %c0_36 = arith.constant 0 : index
    %c16 = arith.constant 16 : index
    %70 = vector.load %arg10[%c0_36, %c16] : memref<8x48xf32, #tpu.memory_space<vmem>>, vector<8x16xf32>
    tpu.vector_store %arg10[%c0_36, %c16], %63 {strides = array<i32>} : memref<8x48xf32, #tpu.memory_space<vmem>>, vector<8x16xf32>,
    %c0_37 = arith.constant 0 : index
    %c32 = arith.constant 32 : index
    %71 = vector.load %arg10[%c0_37, %c32] : memref<8x48xf32, #tpu.memory_space<vmem>>, vector<8x16xf32>
    tpu.vector_store %arg10[%c0_37, %c32], %68 {strides = array<i32>} : memref<8x48xf32, #tpu.memory_space<vmem>>, vector<8x16xf32>,
    return
  }
  func.func @transform_0(%arg0: i32) -> (i32, i32) {
    %c0_i32 = arith.constant 0 : i32
    %c0_i32_0 = arith.constant 0 : i32
    return %arg0, %c0_i32 : i32, i32
  }
  func.func @transform_1(%arg0: i32) -> (i32, i32) {
    %c0_i32 = arith.constant 0 : i32
    %c0_i32_0 = arith.constant 0 : i32
    return %arg0, %c0_i32 : i32, i32
  }
  func.func @transform_2(%arg0: i32) -> (i32, i32) {
    %c0_i32 = arith.constant 0 : i32
    %c0_i32_0 = arith.constant 0 : i32
    return %arg0, %c0_i32 : i32, i32
  }
  func.func @transform_3(%arg0: i32) -> (i32, i32) {
    %c0_i32 = arith.constant 0 : i32
    %c0_i32_0 = arith.constant 0 : i32
    %c0_i32_1 = arith.constant 0 : i32
    return %c0_i32, %c0_i32_0 : i32, i32
  }
  func.func @transform_4(%arg0: i32) -> (i32, i32) {
    %c0_i32 = arith.constant 0 : i32
    %c0_i32_0 = arith.constant 0 : i32
    %c0_i32_1 = arith.constant 0 : i32
    return %c0_i32, %c0_i32_0 : i32, i32
  }
  func.func @transform_5(%arg0: i32) -> (i32, i32) {
    %c0_i32 = arith.constant 0 : i32
    %c0_i32_0 = arith.constant 0 : i32
    %c0_i32_1 = arith.constant 0 : i32
    return %c0_i32, %c0_i32_0 : i32, i32
  }
  func.func @transform_6(%arg0: i32) -> (i32, i32) {
    %c0_i32 = arith.constant 0 : i32
    %c0_i32_0 = arith.constant 0 : i32
    %c0_i32_1 = arith.constant 0 : i32
    return %c0_i32, %c0_i32_0 : i32, i32
  }
  func.func @transform_7(%arg0: i32) -> (i32, i32) {
    %c0_i32 = arith.constant 0 : i32
    %c0_i32_0 = arith.constant 0 : i32
    %c0_i32_1 = arith.constant 0 : i32
    return %c0_i32, %c0_i32_0 : i32, i32
  }
  func.func @transform_8(%arg0: i32) -> (i32, i32) {
    %c0_i32 = arith.constant 0 : i32
    %c0_i32_0 = arith.constant 0 : i32
    %c0_i32_1 = arith.constant 0 : i32
    return %c0_i32, %c0_i32_0 : i32, i32
  }
  func.func @transform_9(%arg0: i32) -> (i32, i32) {
    %c0_i32 = arith.constant 0 : i32
    %c0_i32_0 = arith.constant 0 : i32
    return %arg0, %c0_i32 : i32, i32
  }
  func.func @transform_10(%arg0: i32) -> (i32, i32) {
    %c0_i32 = arith.constant 0 : i32
    %c0_i32_0 = arith.constant 0 : i32
    return %arg0, %c0_i32 : i32, i32
  }
}

</mosaic_0001>

<bundles_post_ra>
// kernel: tpu_custom_call.1
= control target key start
LH: loop header
LB: loop body
LE: loop exit
PB: predicated region body
PF: predicated region fallthrough
CT: control target
= control target key end

     0   :  { %16 = vsyncpa [#allocation3], 0  ;;  %s832_s0 = inlined_call_operand.vmem [shape: f32[8,96], index: 0, kind: input, shape index: {}]   ;;  %s833_s1 = inlined_call_operand.vmem [shape: f32[8,3], index: 1, kind: input, shape index: {}]   ;;  %s834_s2 = inlined_call_operand.vmem [shape: f32[8,16], index: 2, kind: input, shape index: {}]   ;;  %s835_s3 = inlined_call_operand.hbm [shape: f32[96,96], index: 3, kind: input, shape index: {}]   ;;  %s836_s4 = inlined_call_operand.vmem [shape: f32[3,96], index: 4, kind: input, shape index: {}]   ;;  %s837_s5 = inlined_call_operand.vmem [shape: f32[1,96], index: 5, kind: input, shape index: {}]   ;;  %s838_s6 = inlined_call_operand.vmem [shape: f32[1,96], index: 6, kind: input, shape index: {}]   ;;  %s839_s7 = inlined_call_operand.hbm [shape: f32[96,96], index: 7, kind: input, shape index: {}]   ;;  %s840_s8 = inlined_call_operand.vmem [shape: f32[1,96], index: 8, kind: input, shape index: {}]   ;;  %s841_s9 = inlined_call_operand.hbm [shape: f32[8,48], index: 9, kind: output, shape index: {0}]   ;;  %s842_s10 = inlined_call_operand.vmem [shape: f32[8,3], index: 10, kind: output, shape index: {1}]  }
   0x1   :  { %17 = vsyncpa [#allocation6], 0 }
   0x2   :  { %18 = vsyncpa [#allocation4], 0  ;;  %s672_s13 = smov [#allocation2]   ;;  %s600_s17 = scalar_lea.hbm %s835_s3, 1536 }
   0x3   :  { %s30_s14 = sshll.u32 %s672_s13, 4  ;;  %p601_p0 = scmp.ne.s32.totalorder %s835_s3, %s600_s17  ;;  %s31_s14 = int_to_ptr.vmem [resolvable:$true] %s30_s14 }
   0x4   :  { %p604_p1 = scmp.lt.u32.totalorder %s600_s17, %s835_s3 }
   0x6   :  { %p606_p2 = pnand %p604_p1, %p601_p0 }
   0x8   :  { %609 = shalt.err (!%p606_p2)
}
   0x9   :  { %s610_s22 = scalar_lea.vmem %s31_s14, 1536  ;;  %p615_p4 = scmp.lt.s32.totalorder %s31_s14, %s31_s14 }
   0xa   :  { %p611_p3 = scmp.ne.s32.totalorder %s31_s14, %s610_s22  ;;  %p616_p5 = scmp.lt.s32.totalorder %s610_s22, %s610_s22 }
   0xc   :  { %p617_p6 = por %p616_p5, %p615_p4 }
   0xe   :  { %p618_p7 = pnand %p617_p6, %p611_p3 }
  0x10   :  { %621 = shalt.err (!%p618_p7)
}
  0x11   :  { %s673_s23 = smov 128   ;;  %s674_s24 = smov 8  }
  0x12   :  { %36 = dma.hbm_to_vmem [thread:$0]  %s835_s3, 1536, %s31_s14, [#allocation3], %s673_s23, %s673_s23, %s674_s24  }
  0x13   :  { %s675_s27 = smov [#allocation5]   ;;  %s622_s11 = scalar_lea.hbm %s839_s7, 1536 }
  0x14   :  { %s48_s28 = sshll.u32 %s675_s27, 4  ;;  %p623_p8 = scmp.ne.s32.totalorder %s839_s7, %s622_s11  ;;  %s49_s28 = int_to_ptr.vmem [resolvable:$true] %s48_s28 }
  0x15   :  { %p626_p9 = scmp.lt.u32.totalorder %s622_s11, %s839_s7 }
  0x17   :  { %p628_p10 = pnand %p626_p9, %p623_p8 }
  0x19   :  { %631 = shalt.err (!%p628_p10)
}
  0x1a   :  { %s632_s17 = scalar_lea.vmem %s49_s28, 1536  ;;  %p637_p12 = scmp.lt.s32.totalorder %s49_s28, %s49_s28 }
  0x1b   :  { %p633_p11 = scmp.ne.s32.totalorder %s49_s28, %s632_s17  ;;  %p638_p13 = scmp.lt.s32.totalorder %s632_s17, %s632_s17 }
  0x1d   :  { %p639_p0 = por %p638_p13, %p637_p12 }
  0x1f   :  { %p640_p1 = pnand %p639_p0, %p633_p11 }
  0x21   :  { %643 = shalt.err (!%p640_p1)
}
  0x22   :  { %54 = dma.hbm_to_vmem [thread:$0]  %s839_s7, 1536, %s49_s28, [#allocation6], %s673_s23, %s673_s23, %s674_s24  }
  0x23   :  { %666 = dma.done.wait [#allocation3], 1536  }
  0x24   :  { %667 = vsyncadd [#allocation3], 4294965760 }
  0x25   :  { %668 = dma.done.wait [#allocation6], 1536  }
  0x26   :  { %669 = vsyncadd [#allocation6], 4294965760  ;;  %v676_v0 = vmov 0.0   ;;  %vm677_vm0 = vmmov 0   ;;  %v678_v1 = vmov 0.0|0.0   ;;  %vm108_vm1 = vcmask 1042432  }
  0x27   :  { %482 = vmatprep.subr.mxu0 %v676_v0  ;;  %484 = vmatprep.mubr.msk.f32.mxu0 %vm677_vm0, %v676_v0  ;;  %vm104_vm2 = vcmask 23552   ;;  %v103_v2 = vld [vmem:[%s836_s4] sm:$0x7]  ;;  %v91_v5 = vld [vmem:[#allocation2 + $0x8] sm:$0xff]  ;;  %v92_v6 = vld [vmem:[#allocation2 + $0x10] sm:$0xff]  ;;  %vm182_vm3 = vcmask 785408  }
  0x28   :  { %559 = vmatprep.subr.bf16.mxu1 %v678_v1  ;;  %538 = vmatprep.mubr.msk.f32.mxu1 %vm677_vm0, %v676_v0  ;;  %v102_v3 = vld [vmem:[%s833_s1] sm:$0xff]  ;;  %v93_v7 = vld [vmem:[#allocation2 + $0x18] sm:$0xff]  ;;  %v95_v11 = vld [vmem:[#allocation2 + $0x28] sm:$0xff]  ;;  %s681_s28 = smov 64   ;;  %s682_s29 = smov 16   ;;  %vm64_vm6 = vcmask 261120  }
  0x29   :  { %v90_v4 = vld [vmem:[#allocation2] sm:$0xff]  ;;  %483 = vmatpush3.msk.msra.mxu0 %vm108_vm1, %v103_v2  ;;  %v545_v9 = vpack.c.bf16 %v93_v7, %v92_v6  ;;  %v274_v14 = vld [vmem:[#allocation5 + $0x8] sm:$0xff]  ;;  %v275_v15 = vld [vmem:[#allocation5 + $0x10] sm:$0xff]  ;;  %vm417_vm7 = vcmask 130048   ;;  %vm419_vm8 = vcmask 261248   ;;  %vm68_vm9 = vcmask 7168  }
  0x2a   :  { %541 = vmatprep.subr.bf16.mxu0 %v678_v1  ;;  %485 = vmatmul.mubr.msk.f32.vlgmr.msra.gmra.mrb[0].mxu0 %vm104_vm2, %v102_v3  ;;  %v542_v8 = vpack.c.bf16 %v91_v5, %v90_v4  ;;  %v94_v10 = vld [vmem:[#allocation2 + $0x20] sm:$0xff]  ;;  %v276_v18 = vld [vmem:[#allocation5 + $0x18] sm:$0xff]  ;;  %v96_v20 = vld [vmem:[#allocation2 + $0x30] sm:$0xff]  ;;  %vm77_vm10 = vcmask 15368   ;;  %vm85_vm11 = vcmask 23568   ;;  %s684_s16 = smov [#allocation7]  }
  0x2b   :  { %511 = vmatprep.mubr.msk.f32.mxu0 %vm677_vm0, %v676_v0  ;;  %v778_v12 = vld [vmem:[%s832_s0] sm:$0xff]  ;;  %v548_v19 = vpack.c.bf16 %v95_v11, %v94_v10  ;;  %v563_v21 = vpack.c.bf16 %v276_v18, %v275_v15  ;;  %v97_v22 = vld [vmem:[#allocation2 + $0x38] sm:$0xff]  ;;  %v278_v24 = vld [vmem:[#allocation5 + $0x28] sm:$0xff]  ;;  %s433_s17 = sshll.u32 %s684_s16, 4  ;;  %vm425_vm12 = vcmask 392448   ;;  %s434_s17 = int_to_ptr.vmem [resolvable:$true] %s433_s17 }
  0x2c   :  { %543 = vmatpush3.bf16.msra.mxu0 %v542_v8  ;;  %v273_v13 = vld [vmem:[#allocation5] sm:$0xff]  ;;  %v87_v16 = vadd.f32 1.0, %v778_v12  ;;  %v551_v25 = vpack.c.bf16 %v97_v22, %v96_v20  ;;  %v99_v28 = vld [vmem:[#allocation2 + $0x48] sm:$0xff]  ;;  %v279_v29 = vld [vmem:[#allocation5 + $0x30] sm:$0xff]  ;;  %v65_v10 = vsel %vm64_vm6, %v778_v12, 0.0  ;;  %s644_s3 = scalar_lea.vmem %s434_s17, 128  ;;  %p649_p3 = scmp.lt.s32.totalorder %s434_s17, %s434_s17 }
  0x2d   :  { %544 = vmatprep.subr.bf16.mxu0 %v678_v1  ;;  %v560_v17 = vpack.c.bf16 %v274_v14, %v273_v13  ;;  %v277_v23 = vld [vmem:[#allocation5 + $0x20] sm:$0xff]  ;;  %v280_v30 = vld [vmem:[#allocation5 + $0x38] sm:$0xff]  ;;  %v100_v33 = vld [vmem:[#allocation2 + $0x50] sm:$0xff]  ;;  %p645_p2 = scmp.ne.s32.totalorder %s434_s17, %s644_s3  ;;  %p650_p4 = scmp.lt.s32.totalorder %s644_s3, %s644_s3 }
  0x2e   :  { %592 = vlog2.f32 %v87_v16  ;;  %v98_v26 = vld [vmem:[#allocation2 + $0x40] sm:$0xff]  ;;  %v566_v27 = vpack.c.bf16 %v278_v24, %v277_v23  ;;  %v569_v32 = vpack.c.bf16 %v280_v30, %v279_v29  ;;  %v101_v34 = vld [vmem:[#allocation2 + $0x58] sm:$0xff]  ;;  %v282_v39 = vld [vmem:[#allocation5 + $0x48] sm:$0xff] }
  0x2f   :  { %561 = vmatpush3.bf16.msra.mxu1 %v560_v17  ;;  %v554_v31 = vpack.c.bf16 %v99_v28, %v98_v26  ;;  %v557_v36 = vpack.c.bf16 %v101_v34, %v100_v33  ;;  %v281_v38 = vld [vmem:[#allocation5 + $0x40] sm:$0xff]  ;;  %v283_v41 = vld [vmem:[#allocation5 + $0x50] sm:$0xff]  ;;  %v284_v42 = vld [vmem:[#allocation5 + $0x58] sm:$0xff]  ;;  %p651_p5 = por %p650_p4, %p649_p3 }
  0x30   :  { %546 = vmatpush3.bf16.msra.mxu0 %v545_v9  ;;  %562 = vmatprep.subr.bf16.mxu1 %v678_v1  ;;  %v572_v40 = vpack.c.bf16 %v282_v39, %v281_v38  ;;  %v575_v43 = vpack.c.bf16 %v284_v42, %v283_v41  ;;  %v450_v44 = vld [vmem:[%s837_s5] ss:$0 sm:$0xff]  ;;  %s679_s5 = smov 112  }
  0x31   :  { %547 = vmatprep.subr.bf16.mxu0 %v678_v1  ;;  %v451_v46 = vld [vmem:[%s838_s6] ss:$0 sm:$0xff]  ;;  %s680_s6 = smov 96   ;;  %p652_p6 = pnand %p651_p5, %p645_p2 }
  0x32   :  { %v452_v51 = vld [vmem:[%s840_s8] ss:$0 sm:$0xff] }
  0x33   :  { %564 = vmatpush3.bf16.msra.mxu1 %v563_v21  ;;  %v406_v58 = vld [vmem:[%s834_s2] sm:$0xff]  ;;  %s683_s2 = smov 32  }
  0x34   :  { %549 = vmatpush3.bf16.msra.mxu0 %v548_v19  ;;  %565 = vmatprep.subr.bf16.mxu1 %v678_v1 }
  0x35   :  { %550 = vmatprep.subr.bf16.mxu0 %v678_v1 }
  0x37   :  { %567 = vmatpush3.bf16.msra.mxu1 %v566_v27 }
  0x38   :  { %552 = vmatpush3.bf16.msra.mxu0 %v551_v25  ;;  %568 = vmatprep.subr.bf16.mxu1 %v678_v1  ;;  %v593_v35 = vpop.eup %592 }
  0x39   :  { %553 = vmatprep.subr.bf16.mxu0 %v678_v1  ;;  %v89_v37 = vmul.f32 0.6931472, %v593_v35 }
  0x3b   :  { %570 = vmatpush3.bf16.msra.mxu1 %v569_v32 }
  0x3c   :  { %555 = vmatpush3.bf16.msra.mxu0 %v554_v31  ;;  %571 = vmatprep.subr.bf16.mxu1 %v678_v1 }
  0x3d   :  { %556 = vmatprep.subr.bf16.mxu0 %v678_v1 }
  0x3f   :  { %573 = vmatpush3.bf16.msra.mxu1 %v572_v40 }
  0x40   :  { %558 = vmatpush3.bf16.msra.mxu0 %v557_v36  ;;  %574 = vmatprep.subr.bf16.mxu1 %v678_v1 }
  0x43   :  { %512 = vmatmul.mubr.msk.f32.vlgmr.msra.gmra.mrb[0].mxu0 %vm182_vm3, %v89_v37  ;;  %576 = vmatpush3.bf16.msra.mxu1 %v575_v43 }
 0x116   :  { %v252_v45 = vpop.f32.mrb[0].mxu0 }
 0x117   :  { %v263_v47 = vmul.f32 %v450_v44, %v252_v45  ;;  %v513_v48 = vpop.f32.mrb[1].mxu0 }
 0x119   :  { %v271_v49 = vadd.f32 %v451_v46, %v263_v47 }
 0x11b   :  { %v272_v50 = vmax.f32 %v271_v49, 0.0 }
 0x11d   :  { %539 = vmatmul.mubr.msk.f32.vlgmr.msra.gmra.mrb[0].mxu1 %vm182_vm3, %v272_v50 }
 0x1f0   :  { %v361_v52 = vpop.f32.mrb[0].mxu1 }
 0x1f1   :  { %v362_v53 = vadd.f32 %v452_v51, %v361_v52  ;;  %v540_v54 = vpop.f32.mrb[1].mxu1 }
 0x1f3   :  { %v365_v55 = vsub.f32 0.0, %v362_v53 }
 0x1f5   :  { %v366_v56 = vmul.f32 1.442695, %v365_v55 }
 0x1f7   :  { %594 = vpow2.f32 %v366_v56 }
 0x201   :  { %v595_v57 = vpop.eup %594 }
 0x202   :  { %369 = vrot.lane.b32.xlu1 %v595_v57, %s679_s5  ;;  %380 = vrot.lane.b32.xlu0 %v595_v57, %s680_s6 }
 0x206   :  { %388 = vrot.lane.b32.xlu0 %v595_v57, %s681_s28  ;;  %408 = vrot.lane.b32.xlu1 %v406_v58, %s682_s29 }
 0x20a   :  { %79 = vrot.lane.b32.xlu1 %v778_v12, %s681_s28  ;;  %71 = vrot.lane.b32.xlu0 %v778_v12, %s680_s6 }
 0x274   :  { %v370_v59 = vpop.permute.xlu1 %369  ;;  %v381_v60 = vpop.permute.xlu0 %380 }
 0x275   :  { %v372_v61 = vmul.f32 %v370_v59, %v362_v53  ;;  %v383_v62 = vadd.f32 %v595_v57, %v381_v60 }
 0x277   :  { %384 = vrot.lane.b32.xlu1 %v372_v61, %s681_s28  ;;  %376 = vrot.lane.b32.xlu0 %v372_v61, %s680_s6 }
 0x278   :  { %v389_v63 = vpop.permute.xlu0 %388  ;;  %v409_v5 = vpop.permute.xlu1 %408 }
 0x279   :  { %v391_v0 = vadd.f32 %v389_v63, %v383_v62 }
 0x27b   :  { %v392_v1 = vadd.f32 1.0, %v391_v0 }
 0x27c   :  { %v80_v11 = vpop.permute.xlu1 %79  ;;  %v72_v14 = vpop.permute.xlu0 %71 }
 0x27d   :  { %596 = vrcp.f32 %v392_v1  ;;  %v82_v13 = vsel %vm64_vm6, %v80_v11, 0.0  ;;  %v74_v15 = vsel %vm64_vm6, %v72_v14, 0.0 }
 0x287   :  { %v597_v2 = vpop.eup %596 }
 0x288   :  { %395 = vrot.lane.b32.xlu0 %v597_v2, %s679_s5  ;;  %598 = vrsqrt.f32 %v597_v2  ;;  %vm401_vm4 = vcmp.eq.f32.partialorder %v597_v2, inf  ;;  %v404_v6 = vand.u32 2147483648, %v597_v2  ;;  %vm403_vm5 = vcmp.eq.f32.partialorder %v597_v2, 0.0 }
 0x292   :  { %v599_v3 = vpop.eup %598 }
 0x293   :  { %v400_v4 = vmul.f32 %v599_v3, %v597_v2 }
 0x295   :  { %v402_v7 = vsel %vm401_vm4, %v597_v2, %v400_v4 }
 0x296   :  { %v405_v8 = vsel %vm403_vm5, %v404_v6, %v402_v7 }
 0x297   :  { %v411_v9 = vmul.f32 %v409_v5, %v405_v8 }
 0x299   :  { %413 = vrot.lane.b32.xlu1 %v411_v9, %s679_s5 }
 0x2a7   :  { %66 = vadd.xlane.f32.xlu0 %v65_v10 }
 0x2ab   :  { %83 = vadd.xlane.f32.xlu0 %v82_v13 }
 0x2bd   :  { %75 = vadd.xlane.f32.xlu1 %v74_v15 }
 0x2e9   :  { %v377_v16 = vpop.permute.xlu0 %376  ;;  %v385_v18 = vpop.permute.xlu1 %384 }
 0x2ea   :  { %v379_v17 = vadd.f32 %v377_v16, %v372_v61 }
 0x2ec   :  { %v387_v19 = vadd.f32 %v385_v18, %v379_v17 }
 0x2fa   :  { %v396_v20 = vpop.permute.xlu0 %395 }
 0x2fb   :  { %v398_v21 = vmul.f32 %v396_v20, %v387_v19 }
 0x2fd   :  { %418 = vst.msk [vmem:[#allocation7] sm:$0xff] %vm417_vm7, %v398_v21 }
 0x2fe   :  { %420 = vst.msk [vmem:[#allocation7] sm:$0xff] %vm419_vm8, %v597_v2 }
 0x30b   :  { %v414_v22 = vpop.permute.xlu1 %413 }
 0x30c   :  { %v416_v23 = vadd.f32 %v414_v22, %v398_v21 }
 0x30e   :  { %422 = vrot.lane.b32.xlu0 %v416_v23, %s683_s2 }
 0x334   :  { %v67_v12 = vpop.xlane.xlu0 %66 }
 0x335   :  { %69 = vst.msk [vmem:[%s842_s10] sm:$0xff] %vm68_vm9, %v67_v12 }
 0x338   :  { %v84_v24 = vpop.xlane.xlu0 %83 }
 0x34a   :  { %v76_v25 = vpop.xlane.xlu1 %75 }
 0x34b   :  { %78 = vst.msk [vmem:[%s842_s10] sm:$0xff] %vm77_vm10, %v76_v25 }
 0x34c   :  { %86 = vst.msk [vmem:[%s842_s10] sm:$0xff] %vm85_vm11, %v84_v24 }
 0x380   :  { %v423_v26 = vpop.permute.xlu0 %422 }
 0x381   :  { %426 = vst.msk [vmem:[#allocation7] sm:$0xff] %vm425_vm12, %v423_v26 }
 0x382   :  { %655 = shalt.err (!%p652_p6)
}
 0x383   :  { %s656_s19 = scalar_lea.hbm %s841_s9, 128 }
 0x384   :  { %p657_p7 = scmp.ne.s32.totalorder %s841_s9, %s656_s19  ;;  %p660_p8 = scmp.lt.u32.totalorder %s656_s19, %s841_s9 }
 0x386   :  { %p662_p9 = pnand %p660_p8, %p657_p7 }
 0x388   :  { %665 = shalt.err (!%p662_p9)
}
 0x389   :  { %436 = dma.vmem_to_hbm [thread:$0]  %s434_s17, 128, %s841_s9, [#allocation4]  }
 0x38a   :  { %670 = dma.done.wait [#allocation4], 128  }
 0x38b   :  { %671 = vsyncadd [#allocation4], 4294967168 }
 0x38c   :  { %444 = vsyncpa [#allocation3], 1 }
 0x38d   :  { %445 = vsyncpa [#allocation6], 1 }
 0x38e   :  { %446 = vsyncpa [#allocation4], 1 }

</bundles_post_ra>
